<compile_context>
chip_gen: v7x
topology: tpu7x:2x2x1
jax: 0.10.0
libtpu: 0.0.40
codegen_flags: <defaults>
</compile_context>

<pallas_src>
import functools

import jax
import jax.numpy as jnp
from jax import lax
from jax.experimental import pallas as pl
from jax.experimental.pallas import tpu as pltpu


def _round_up(x, m):
    return ((x + m - 1) // m) * m


def _global_max_kernel(x_ref, o_ref, acc_ref, *, neutral, l_total, tl,
                       n_chunks, needs_mask, unroll):
    """Streaming global max over the flattened H*W (lane) axis.

    x_ref:   (tr, tl)  input tile (rows = flattened N*C, cols = flattened H*W)
    o_ref:   (tr, 1)   output tile (resident across k; written once at last k)
    acc_ref: (tr, 128) lane-dense running-max scratch (persists across k)
    """
    k = pl.program_id(1)
    nk = pl.num_programs(1)

    @pl.when(k == 0)
    def _init():
        acc_ref[...] = jnp.full(acc_ref.shape, neutral, dtype=acc_ref.dtype)

    def _fold(j, part):
        start = pl.multiple_of(j * 128, 128)
        chunk = x_ref[:, pl.ds(start, 128)]
        if needs_mask:
            # Mask lanes beyond the true H*W extent with the max identity so
            # unspecified boundary-block data can never win the max.
            col = k * tl + start + lax.broadcasted_iota(
                jnp.int32, chunk.shape, 1)
            chunk = jnp.where(col < l_total, chunk,
                              jnp.full_like(chunk, neutral))
        return jnp.maximum(part, chunk)

    # Pure VPU elementwise max on dense 128-lane vregs every k step.
    acc_ref[...] = lax.fori_loop(0, n_chunks, _fold, acc_ref[...],
                                 unroll=unroll)

    @pl.when(k == nk - 1)
    def _finalize():
        # Single XLU cross-lane reduce + lane-sparse store per row tile.
        o_ref[...] = jnp.max(acc_ref[...], axis=-1,
                             keepdims=True).astype(o_ref.dtype)


def domain_classifier_forward(x, *, min_pallas_bytes=1 << 20,
                              tile_budget_bytes=16 * 1024 * 1024):
    """domain_classifier.forward: adaptive_max_pool2d(x, (1,1)) + flatten.

    x: (N, C, H, W) -> (N, C), global max over the spatial dims.
    """
    n, c, h, w = x.shape
    r, l = n * c, h * w
    dtype = x.dtype
    itemsize = jnp.dtype(dtype).itemsize

    # Tiny inputs: launch / DMA-setup overhead dwarfs the reduction.
    if r * l * itemsize < min_pallas_bytes:
        return jnp.max(x, axis=(2, 3))

    # Identity element for max (accumulator init + tail-mask fill).
    if jnp.issubdtype(dtype, jnp.floating):
        neutral = float("-inf")
    elif jnp.issubdtype(dtype, jnp.integer):
        neutral = int(jnp.iinfo(dtype).min)
    else:
        # bool / exotic dtypes: let XLA handle it.
        return jnp.max(x, axis=(2, 3))

    # ---- row (N*C) tiling: "parallel" grid axis ------------------------------
    # Sublane pack by dtype: 8 (f32), 16 (bf16), 32 (int8/fp8).
    pack = max(8, 32 // itemsize)
    num_row_tiles = pl.cdiv(r, 512)
    if r >= 2 * pack:
        # >= 2 row blocks so v7x's two TensorCores both stream.
        num_row_tiles = max(2, num_row_tiles)
    tr = _round_up(pl.cdiv(r, num_row_tiles), pack)
    grid_r = pl.cdiv(r, tr)

    # ---- column (H*W) tiling: "arbitrary" reduction axis ---------------------
    # ~16 MiB per step => 32 MiB double-buffered; fits v7x's 64 MiB VMEM.
    tl_cap = max(128, (tile_budget_bytes // (tr * itemsize)) // 128 * 128)
    num_col_tiles = pl.cdiv(l, tl_cap)
    tl = _round_up(pl.cdiv(l, num_col_tiles), 128)
    grid_l = pl.cdiv(l, tl)

    needs_mask = (l % tl) != 0          # ragged last column tile
    n_chunks = tl // 128                # static 128-lane chunks per tile
    unroll = min(8, n_chunks)

    x2d = x.reshape(r, l)               # no jnp.pad: stream the array as-is

    kernel = functools.partial(
        _global_max_kernel,
        neutral=neutral, l_total=l, tl=tl,
        n_chunks=n_chunks, needs_mask=needs_mask, unroll=unroll)

    out = pl.pallas_call(
        kernel,
        out_shape=jax.ShapeDtypeStruct((r, 1), dtype),
        grid_spec=pltpu.PrefetchScalarGridSpec(
            num_scalar_prefetch=0,
            grid=(grid_r, grid_l),
            in_specs=[pl.BlockSpec((tr, tl), lambda i, k: (i, k))],
            out_specs=pl.BlockSpec((tr, 1), lambda i, k: (i, 0)),
            scratch_shapes=[pltpu.VMEM((tr, 128), dtype)],
        ),
        compiler_params=pltpu.CompilerParams(
            dimension_semantics=("parallel", "arbitrary"),
            vmem_limit_bytes=48 * 1024 * 1024,
        ),
        cost_estimate=pl.CostEstimate(
            flops=r * l,
            transcendentals=0,
            bytes_accessed=(r * l + r) * itemsize,
        ),
    )(x2d)

    return out.reshape(n, c)


if __name__ == "__main__":
    key = jax.random.PRNGKey(0)
    k1, k2, k3 = jax.random.split(key, 3)

    # Small demo shape consistent with the module (N=2, n_classes=4, 16x16).
    N, n_classes, H, W = 2, 4, 16, 16
    x = jax.random.normal(k1, (N, n_classes, H, W), jnp.float32)
    y = jax.block_until_ready(domain_classifier_forward(x, min_pallas_bytes=0))
    assert y.shape == (N, n_classes)
    assert jnp.allclose(y, jnp.max(x, axis=(2, 3))), "mismatch (small)"

    # 2 balanced row tiles (megacore path), single k step, no tail mask.
    x2 = jax.random.normal(k2, (4, 160, 80, 80), jnp.float32)
    y2 = jax.block_until_ready(domain_classifier_forward(x2, min_pallas_bytes=0))
    assert y2.shape == (4, 160)
    assert jnp.allclose(y2, jnp.max(x2, axis=(2, 3))), "mismatch (tiled)"

    # Ragged H*W (1221 cols) + tiny tile budget: many k steps + in-kernel
    # tail masking of the final column tile.
    x3 = jax.random.normal(k3, (4, 160, 33, 37), jnp.float32)
    y3 = jax.block_until_ready(
        domain_classifier_forward(x3, min_pallas_bytes=0,
                                  tile_budget_bytes=256 * 1024))
    assert y3.shape == (4, 160)
    assert jnp.allclose(y3, jnp.max(x3, axis=(2, 3))), "mismatch (ragged/masked)"

    print("KERNEL_OK")
</pallas_src>

<mosaic_0001>
module attributes {stable_mosaic.version = 11 : i64} {
  func.func @_global_max_kernel(%arg0: i32, %arg1: i32, %arg2: memref<8x256xf32, #tpu.memory_space<vmem>>, %arg3: memref<8x1xf32, #tpu.memory_space<vmem>>, %arg4: memref<8x128xf32, #tpu.memory_space<vmem>>) attributes {dimension_semantics = [#tpu.dimension_semantics<parallel>, #tpu.dimension_semantics<arbitrary>], iteration_bounds = array<i64: 1, 1>, scalar_prefetch = 0 : i64, scratch_operands = 1 : i64, tpu.core_type = #tpu.core_type<tc>, window_params = [{transform_indices = @transform_0, window_bounds = array<i64: 8, 256>}, {transform_indices = @transform_1, window_bounds = array<i64: 8, 1>}]} {
    %c0_i32 = arith.constant 0 : i32
    %0 = arith.cmpi eq, %arg1, %c0_i32 : i32
    %1 = arith.extui %0 : i1 to i32
    %c0_i32_0 = arith.constant 0 : i32
    %2 = arith.cmpi ne, %1, %c0_i32_0 : i32
    scf.if %2 {
      %cst = arith.constant 0xFF800000 : f32
      %18 = vector.broadcast %cst : f32 to vector<8x128xf32>
      %c0_10 = arith.constant 0 : index
      %c0_11 = arith.constant 0 : index
      %19 = vector.load %arg4[%c0_10, %c0_11] : memref<8x128xf32, #tpu.memory_space<vmem>>, vector<8x128xf32>
      tpu.vector_store %arg4[%c0_10, %c0_11], %18 {strides = array<i32>} : memref<8x128xf32, #tpu.memory_space<vmem>>, vector<8x128xf32>,
    } else {
    }
    %c0 = arith.constant 0 : index
    %c0_1 = arith.constant 0 : index
    %3 = vector.load %arg4[%c0, %c0_1] : memref<8x128xf32, #tpu.memory_space<vmem>>, vector<8x128xf32>
    %c0_i32_2 = arith.constant 0 : i32
    %c128_i32 = arith.constant 128 : i32
    %4 = arith.muli %c0_i32_2, %c128_i32 : i32
    %5 = tpu.assume_multiple %4, 128 : i32
    %c0_3 = arith.constant 0 : index
    %6 = arith.index_cast %5 : i32 to index
    %7 = vector.load %arg2[%c0_3, %6] : memref<8x256xf32, #tpu.memory_space<vmem>>, vector<8x128xf32>
    %8 = arith.maximumf %3, %7 : vector<8x128xf32>
    %c1_i32 = arith.constant 1 : i32
    %c128_i32_4 = arith.constant 128 : i32
    %9 = arith.muli %c1_i32, %c128_i32_4 : i32
    %10 = tpu.assume_multiple %9, 128 : i32
    %c0_5 = arith.constant 0 : index
    %11 = arith.index_cast %10 : i32 to index
    %12 = vector.load %arg2[%c0_5, %11] : memref<8x256xf32, #tpu.memory_space<vmem>>, vector<8x128xf32>
    %13 = arith.maximumf %8, %12 : vector<8x128xf32>
    %c2_i32 = arith.constant 2 : i32
    %c0_6 = arith.constant 0 : index
    %c0_7 = arith.constant 0 : index
    %14 = vector.load %arg4[%c0_6, %c0_7] : memref<8x128xf32, #tpu.memory_space<vmem>>, vector<8x128xf32>
    tpu.vector_store %arg4[%c0_6, %c0_7], %13 {strides = array<i32>} : memref<8x128xf32, #tpu.memory_space<vmem>>, vector<8x128xf32>,
    %c0_i32_8 = arith.constant 0 : i32
    %15 = arith.cmpi eq, %arg1, %c0_i32_8 : i32
    %16 = arith.extui %15 : i1 to i32
    %c0_i32_9 = arith.constant 0 : i32
    %17 = arith.cmpi ne, %16, %c0_i32_9 : i32
    scf.if %17 {
      %c0_10 = arith.constant 0 : index
      %c0_11 = arith.constant 0 : index
      %18 = vector.load %arg4[%c0_10, %c0_11] : memref<8x128xf32, #tpu.memory_space<vmem>>, vector<8x128xf32>
      %cst = arith.constant dense<0xFF800000> : vector<8xf32>
      %19 = vector.multi_reduction <maximumf>, %18, %cst [1] : vector<8x128xf32> to vector<8xf32>
      %20 = vector.shape_cast %19 : vector<8xf32> to vector<8x1xf32>
      %c0_12 = arith.constant 0 : index
      %c0_13 = arith.constant 0 : index
      %21 = vector.load %arg3[%c0_12, %c0_13] : memref<8x1xf32, #tpu.memory_space<vmem>>, vector<8x1xf32>
      tpu.vector_store %arg3[%c0_12, %c0_13], %20 {strides = array<i32>} : memref<8x1xf32, #tpu.memory_space<vmem>>, vector<8x1xf32>,
    } else {
    }
    return
  }
  func.func @transform_0(%arg0: i32, %arg1: i32) -> (i32, i32) {
    %c0_i32 = arith.constant 0 : i32
    return %arg0, %arg1 : i32, i32
  }
  func.func @transform_1(%arg0: i32, %arg1: i32) -> (i32, i32) {
    %c0_i32 = arith.constant 0 : i32
    %c0_i32_0 = arith.constant 0 : i32
    return %arg0, %c0_i32 : i32, i32
  }
}

</mosaic_0001>

<bundles_post_ra>
// kernel: tpu_custom_call.1
= control target key start
LH: loop header
LB: loop body
LE: loop exit
PB: predicated region body
PF: predicated region fallthrough
CT: control target
= control target key end

     0   :  { %6 = vsyncpa [#allocation4], 0  ;;  %s70_s6 = smov [#allocation3]   ;;  %s96_s0 = inlined_call_operand.hbm [shape: f32[8,256], index: 0, kind: input, shape index: {}]   ;;  %s97_s1 = inlined_call_operand.vmem [shape: f32[8,1], index: 1, kind: output, shape index: {}]  }
   0x1   :  { %s13_s7 = sshll.u32 %s70_s6, 4  ;;  %s46_s10 = scalar_lea.hbm %s96_s0, 256  ;;  %s14_s7 = int_to_ptr.vmem [resolvable:$true] %s13_s7 }
   0x2   :  { %p47_p0 = scmp.ne.s32.totalorder %s96_s0, %s46_s10  ;;  %p50_p1 = scmp.lt.u32.totalorder %s46_s10, %s96_s0 }
   0x4   :  { %p52_p2 = pnand %p50_p1, %p47_p0 }
   0x6   :  { %55 = shalt.err (!%p52_p2)
}
   0x7   :  { %s56_s15 = scalar_lea.vmem %s14_s7, 256  ;;  %p61_p4 = scmp.lt.s32.totalorder %s14_s7, %s14_s7 }
   0x8   :  { %p57_p3 = scmp.ne.s32.totalorder %s14_s7, %s56_s15  ;;  %p62_p5 = scmp.lt.s32.totalorder %s56_s15, %s56_s15 }
   0xa   :  { %p63_p6 = por %p62_p5, %p61_p4 }
   0xc   :  { %p64_p7 = pnand %p63_p6, %p57_p3 }
   0xe   :  { %67 = shalt.err (!%p64_p7)
}
   0xf   :  { %16 = dma.hbm_to_vmem [thread:$0]  %s96_s0, 256, %s14_s7, [#allocation4]  }
  0x10   :  { %68 = dma.done.wait [#allocation4], 256  }
  0x11   :  { %69 = vsyncadd [#allocation4], 4294967040  ;;  %v26_v0 = vld [vmem:[#allocation3] sm:$0xff]  ;;  %v29_v1 = vld [vmem:[#allocation3 + $0x8] sm:$0xff]  ;;  %vm38_vm0 = vcmask 7168  }
  0x12   :  { %v30_v2 = vmax.f32 %v26_v0, %v29_v1 }
  0x14   :  { %36 = vmax.xlane.f32.xlu0 %v30_v2 }
  0xa1   :  { %v37_v3 = vpop.xlane.xlu0 %36 }
  0xa2   :  { %39 = vst.msk [vmem:[%s97_s1] sm:$0xff] %vm38_vm0, %v37_v3 }
  0xa3   :  { %44 = vsyncpa [#allocation4], 1 }

</bundles_post_ra>
